<compile_context>
chip_gen: v6e
topology: v6e:2x2x1
jax: 0.10.0
libtpu: 0.0.40
codegen_flags: <defaults>
</compile_context>

<pallas_src>
import jax
import jax.numpy as jnp
from jax import lax
from jax.experimental import pallas as pl
from jax.experimental.pallas import tpu as pltpu

_LANE = 128
_SUBLANE = 8
_TILE_ROWS = 2048  # (2048, 128) f32 block = 1 MiB; 2 inputs x 2 buffers = 4 MiB VMEM


def _mse_sum_single_kernel(pred_ref, tgt_ref, out_ref):
    """Whole (small) problem in one VMEM block: direct reduce to a scalar."""
    d = pred_ref[...].astype(jnp.float32) - tgt_ref[...].astype(jnp.float32)
    out_ref[0, 0] = jnp.sum(d * d)


def _make_mse_sum_tiled_kernel(total_rows, tile_rows, need_mask):
    """Streaming kernel: per-step VPU-only fold into an (8,128) VMEM accumulator,
    single XLU cross-lane reduce + SMEM scalar write in the epilogue."""

    def kernel(pred_ref, tgt_ref, out_ref, acc_ref):
        i = pl.program_id(0)

        @pl.when(i == 0)
        def _():
            acc_ref[...] = jnp.zeros_like(acc_ref)

        d = pred_ref[...].astype(jnp.float32) - tgt_ref[...].astype(jnp.float32)
        if need_mask:
            # Mask rows of the ragged tail block that fall past the real data.
            row = i * tile_rows + lax.broadcasted_iota(jnp.int32, d.shape, 0)
            d = jnp.where(row < total_rows, d, 0.0)
        sq = d * d
        # Fold (tile_rows, 128) -> (8, 128): pure elementwise vreg adds (VPU),
        # keeps the cross-lane/XLU reduce out of the streaming loop.
        acc_ref[...] += sq.reshape(tile_rows // _SUBLANE, _SUBLANE, _LANE).sum(axis=0)

        @pl.when(i == pl.num_programs(0) - 1)
        def _():
            out_ref[0, 0] = jnp.sum(acc_ref[...])

    return kernel


def mse_loss(pred, target, reduction="mean"):
    """Pallas equivalent of MseLoss.forward: mean((pred - stop_grad(target))**2)."""
    del reduction  # the reference module always takes the mean
    target = lax.stop_gradient(target)  # torch .detach()

    n = pred.size
    p = pred.reshape(-1)
    t = target.reshape(-1)

    # Only pad when the flat length is not a multiple of the lane width (128).
    # For typical NCHW f32 tensors (incl. the demo 2*4*16*16 = 2048) this is a
    # pure reshape, no HBM copy. Padded entries are zero in both operands so
    # they contribute nothing to the sum.
    if n % _LANE != 0:
        pad = _LANE - n % _LANE
        p = jnp.pad(p, (0, pad))
        t = jnp.pad(t, (0, pad))

    rows = p.shape[0] // _LANE
    p2 = p.reshape(rows, _LANE)
    t2 = t.reshape(rows, _LANE)

    if rows <= _TILE_ROWS:
        # Small-input fast path: a single full-array block, no grid/pipeline
        # overhead and no padding beyond the optional lane pad above.
        sq_sum = pl.pallas_call(
            _mse_sum_single_kernel,
            out_shape=jax.ShapeDtypeStruct((1, 1), jnp.float32),
            grid_spec=pltpu.PrefetchScalarGridSpec(
                num_scalar_prefetch=0,
                grid=(1,),
                in_specs=[
                    pl.BlockSpec((rows, _LANE), lambda i: (0, 0)),
                    pl.BlockSpec((rows, _LANE), lambda i: (0, 0)),
                ],
                out_specs=pl.BlockSpec(
                    (1, 1), lambda i: (0, 0), memory_space=pltpu.SMEM
                ),
            ),
            compiler_params=pltpu.CompilerParams(
                dimension_semantics=("arbitrary",)
            ),
        )(p2, t2)
    else:
        num_tiles = pl.cdiv(rows, _TILE_ROWS)
        need_mask = (rows % _TILE_ROWS) != 0
        kernel = _make_mse_sum_tiled_kernel(rows, _TILE_ROWS, need_mask)
        # TODO(synk): on v7x, additionally shard the stream across the 2 TCs
        # (grid=(2, tiles_per_core), "parallel" leading axis) for ~2x bandwidth.
        sq_sum = pl.pallas_call(
            kernel,
            out_shape=jax.ShapeDtypeStruct((1, 1), jnp.float32),
            grid_spec=pltpu.PrefetchScalarGridSpec(
                num_scalar_prefetch=0,
                grid=(num_tiles,),
                in_specs=[
                    pl.BlockSpec((_TILE_ROWS, _LANE), lambda i: (i, 0)),
                    pl.BlockSpec((_TILE_ROWS, _LANE), lambda i: (i, 0)),
                ],
                out_specs=pl.BlockSpec(
                    (1, 1), lambda i: (0, 0), memory_space=pltpu.SMEM
                ),
                scratch_shapes=[pltpu.VMEM((_SUBLANE, _LANE), jnp.float32)],
            ),
            compiler_params=pltpu.CompilerParams(
                dimension_semantics=("arbitrary",)
            ),
        )(p2, t2)

    return sq_sum[0, 0] / jnp.float32(n)  # 'mean' reduction


if __name__ == "__main__":
    key = jax.random.PRNGKey(0)
    kp, kt = jax.random.split(key)

    # 1) Small NCHW demo input, matching the PyTorch module's usage
    #    (single-block fast path, no padding).
    pred = jax.random.normal(kp, (2, 4, 16, 16), dtype=jnp.float32)
    target = jax.random.normal(kt, (2, 4, 16, 16), dtype=jnp.float32)
    loss = mse_loss(pred, target)
    jax.block_until_ready(loss)
    ref = jnp.mean((pred - target) ** 2)
    assert jnp.allclose(loss, ref, rtol=1e-6, atol=1e-6), (loss, ref)

    # 2) Larger input exercising the tiled streaming path incl. a ragged tail
    #    block (294912 elems -> 2304 rows -> 2 grid steps, last one masked).
    kp2, kt2 = jax.random.split(jax.random.PRNGKey(1))
    pred_big = jax.random.normal(kp2, (8, 8, 64, 72), dtype=jnp.float32)
    target_big = jax.random.normal(kt2, (8, 8, 64, 72), dtype=jnp.float32)
    loss_big = mse_loss(pred_big, target_big)
    jax.block_until_ready(loss_big)
    ref_big = jnp.mean((pred_big - target_big) ** 2)
    assert jnp.allclose(loss_big, ref_big, rtol=1e-5, atol=1e-6), (loss_big, ref_big)

    # 3) Flat length not a multiple of 128 -> minimal lane-pad path.
    kp3, kt3 = jax.random.split(jax.random.PRNGKey(2))
    pred_r = jax.random.normal(kp3, (2, 3, 17, 19), dtype=jnp.float32)
    target_r = jax.random.normal(kt3, (2, 3, 17, 19), dtype=jnp.float32)
    loss_r = mse_loss(pred_r, target_r)
    jax.block_until_ready(loss_r)
    ref_r = jnp.mean((pred_r - target_r) ** 2)
    assert jnp.allclose(loss_r, ref_r, rtol=1e-6, atol=1e-6), (loss_r, ref_r)

    print("KERNEL_OK")
</pallas_src>

<mosaic_0001>
module attributes {stable_mosaic.version = 11 : i64} {
  func.func @_mse_sum_single_kernel(%arg0: i32, %arg1: memref<16x128xf32, #tpu.memory_space<vmem>>, %arg2: memref<16x128xf32, #tpu.memory_space<vmem>>, %arg3: memref<1x1xf32, #tpu.memory_space<smem>>) attributes {dimension_semantics = [#tpu.dimension_semantics<arbitrary>], iteration_bounds = array<i64: 1>, scalar_prefetch = 0 : i64, scratch_operands = 0 : i64, tpu.core_type = #tpu.core_type<tc>, window_params = [{pipeline_mode = #tpu.pipeline_mode<synchronous>, transform_indices = @transform_0, window_bounds = array<i64: 16, 128>}, {pipeline_mode = #tpu.pipeline_mode<synchronous>, transform_indices = @transform_1, window_bounds = array<i64: 16, 128>}, {transform_indices = @transform_2, window_bounds = array<i64: 1, 1>}]} {
    %c0 = arith.constant 0 : index
    %c0_0 = arith.constant 0 : index
    %0 = vector.load %arg1[%c0, %c0_0] : memref<16x128xf32, #tpu.memory_space<vmem>>, vector<16x128xf32>
    %c0_1 = arith.constant 0 : index
    %c0_2 = arith.constant 0 : index
    %1 = vector.load %arg2[%c0_1, %c0_2] : memref<16x128xf32, #tpu.memory_space<vmem>>, vector<16x128xf32>
    %2 = arith.subf %0, %1 : vector<16x128xf32>
    %3 = arith.mulf %2, %2 : vector<16x128xf32>
    %4 = vector.shape_cast %3 : vector<16x128xf32> to vector<1x16x128xf32>
    %cst = arith.constant dense<0.000000e+00> : vector<1xf32>
    %5 = vector.multi_reduction <add>, %4, %cst [1, 2] : vector<1x16x128xf32> to vector<1xf32>
    %6 = vector.shape_cast %5 : vector<1xf32> to vector<1x1x1xf32>
    %7 = vector.extract %6[0, 0, 0] : f32 from vector<1x1x1xf32>
    %c0_3 = arith.constant 0 : index
    %c0_4 = arith.constant 0 : index
    %8 = memref.load %arg3[%c0_3, %c0_4] : memref<1x1xf32, #tpu.memory_space<smem>>
    memref.store %7, %arg3[%c0_3, %c0_4] : memref<1x1xf32, #tpu.memory_space<smem>>
    return
  }
  func.func @transform_0(%arg0: i32) -> (i32, i32) {
    %c0_i32 = arith.constant 0 : i32
    %c0_i32_0 = arith.constant 0 : i32
    %c0_i32_1 = arith.constant 0 : i32
    return %c0_i32, %c0_i32_0 : i32, i32
  }
  func.func @transform_1(%arg0: i32) -> (i32, i32) {
    %c0_i32 = arith.constant 0 : i32
    %c0_i32_0 = arith.constant 0 : i32
    %c0_i32_1 = arith.constant 0 : i32
    return %c0_i32, %c0_i32_0 : i32, i32
  }
  func.func @transform_2(%arg0: i32) -> (i32, i32) {
    %c0_i32 = arith.constant 0 : i32
    %c0_i32_0 = arith.constant 0 : i32
    %c0_i32_1 = arith.constant 0 : i32
    return %c0_i32, %c0_i32_0 : i32, i32
  }
}

</mosaic_0001>

<bundles_post_ra>
// kernel: tpu_custom_call.1
= control target key start
LH: loop header
LB: loop body
LE: loop exit
PB: predicated region body
PF: predicated region fallthrough
CT: control target
= control target key end

     0   :  { %7 = vsyncpa [#allocation3], 0  ;;  %s165_s0 = inlined_call_operand.hbm [shape: f32[16,128], index: 0, kind: input, shape index: {}]   ;;  %s166_s1 = inlined_call_operand.hbm [shape: f32[16,128], index: 1, kind: input, shape index: {}]   ;;  %s167_s2 = inlined_call_operand.hbm [shape: f32[1,1], index: 2, kind: output, shape index: {}]  }
   0x1   :  { %8 = vsyncpa [#allocation6], 0 }
   0x2   :  { %9 = vsyncpa [#allocation4], 0  ;;  %s136_s9 = smov [#allocation2]  }
   0x3   :  { %s15_s10 = sshll.u32 %s136_s9, 4  ;;  %s16_s10 = int_to_ptr.vmem [resolvable:$true] %s15_s10 }
   0x4   :  { %s90_s11 = scalar_lea.vmem %s16_s10, 256  ;;  %p95_p1 = scmp.lt.s32.totalorder %s16_s10, %s16_s10 }
   0x5   :  { %p91_p0 = scmp.ne.s32.totalorder %s16_s10, %s90_s11  ;;  %p96_p2 = scmp.lt.s32.totalorder %s90_s11, %s90_s11 }
   0x7   :  { %p97_p3 = por %p96_p2, %p95_p1 }
   0x9   :  { %p98_p4 = pnand %p97_p3, %p91_p0 }
   0xb   :  { %101 = shalt.err (!%p98_p4)
}
   0xc   :  { %s137_s12 = smov 128   ;;  %s138_s13 = smov 8  }
   0xd   :  { %21 = dma.hbm_to_vmem [thread:$0]  %s165_s0, 256, %s16_s10, [#allocation3], %s137_s12, %s137_s12, %s138_s13  }
   0xe   :  { %s139_s16 = smov [#allocation5]  }
   0xf   :  { %s27_s17 = sshll.u32 %s139_s16, 4  ;;  %s28_s17 = int_to_ptr.vmem [resolvable:$true] %s27_s17 }
  0x10   :  { %s110_s18 = scalar_lea.vmem %s28_s17, 256  ;;  %p115_p6 = scmp.lt.s32.totalorder %s28_s17, %s28_s17 }
  0x11   :  { %p111_p5 = scmp.ne.s32.totalorder %s28_s17, %s110_s18  ;;  %p116_p7 = scmp.lt.s32.totalorder %s110_s18, %s110_s18 }
  0x13   :  { %p117_p8 = por %p116_p7, %p115_p6 }
  0x15   :  { %p118_p9 = pnand %p117_p8, %p111_p5 }
  0x17   :  { %121 = shalt.err (!%p118_p9)
}
  0x18   :  { %33 = dma.hbm_to_vmem [thread:$0]  %s166_s1, 256, %s28_s17, [#allocation6], %s137_s12, %s137_s12, %s138_s13  }
  0x19   :  { %130 = dma.done.wait [#allocation3], 256  }
  0x1a   :  { %131 = vsyncadd [#allocation3], 4294967040 }
  0x1b   :  { %132 = dma.done.wait [#allocation6], 256  }
  0x1c   :  { %133 = vsyncadd [#allocation6], 4294967040  ;;  %v40_v0 = vld [vmem:[#allocation2] sm:$0xff]  ;;  %v41_v1 = vld [vmem:[#allocation2 + $0x8] sm:$0xff]  ;;  %s140_s1 = smov [#allocation7]  }
  0x1d   :  { %v42_v2 = vld [vmem:[#allocation5] sm:$0xff]  ;;  %v43_v3 = vld [vmem:[#allocation5 + $0x8] sm:$0xff] }
  0x1e   :  { %v44_v4 = vsub.f32 %v40_v0, %v42_v2  ;;  %v45_v5 = vsub.f32 %v41_v1, %v43_v3 }
  0x20   :  { %v46_v6 = vmul.f32 %v44_v4, %v44_v4  ;;  %v47_v7 = vmul.f32 %v45_v5, %v45_v5 }
  0x22   :  { %v48_v8 = vadd.f32 %v47_v7, %v46_v6 }
  0x24   :  { %49 = vadd.xlane.f32.xlu0 %v48_v8 }
  0xad   :  { %v50_v9 = vpop.xlane.xlu0 %49 }
  0xae   :  { %v51_v10 = vrot.slane %v50_v9, 4 }
  0xb0   :  { %v52_v11 = vadd.f32 %v51_v10, %v50_v9 }
  0xb2   :  { %v53_v12 = vrot.slane %v52_v11, 2 }
  0xb4   :  { %v54_v13 = vadd.f32 %v53_v12, %v52_v11 }
  0xb6   :  { %v55_v14 = vrot.slane %v54_v13, 1 }
  0xb8   :  { %v56_v15 = vadd.f32 %v55_v14, %v54_v13 }
  0xba   :  { %75 = vpush %v56_v15 }
  0xeb   :  { %s76_s0 = spop %75 }
  0xec   :  { %59 = sst [smem:[#allocation7]] %s76_s0 }
  0xed   :  { %67 = dma.smem_to_hbm %s140_s1, 16, %s167_s2, [#allocation4]  }
  0xee   :  { %134 = dma.done.wait [#allocation4], 16  }
  0xef   :  { %135 = vsyncadd [#allocation4], 4294967280 }
  0xf0   :  { %71 = sfence }
  0xf1   :  { %72 = vsyncpa [#allocation3], 1 }
  0xf2   :  { %73 = vsyncpa [#allocation6], 1 }
  0xf3   :  { %74 = vsyncpa [#allocation4], 1 }

</bundles_post_ra>
